<compile_context>
chip_gen: v5e
topology: v5e:2x2
jax: 0.10.0
libtpu: 0.0.40
codegen_flags: <defaults>
</compile_context>

<pallas_src>
import math

import jax
import jax.numpy as jnp
from jax.experimental import pallas as pl
from jax.experimental.pallas import tpu as pltpu


# ---------------------------------------------------------------------------
# Kernel: one streamed (tile_s, tile_n) tile of x plus the resident pe column.
#   x_ref : (tile_s, tile_n)   -- streamed over the (lane, seq) grid
#   pe_ref: (1, tile_n)        -- resident in VMEM across inner (seq) steps
#   o_ref : (tile_s, tile_n)
# The sublane broadcast of pe rides in slack XLU/VPU slots of this HBM-bound add.
# ---------------------------------------------------------------------------
def pe_add_kernel(x_ref, pe_ref, o_ref):
    o_ref[...] = x_ref[...] + pe_ref[...]


def make_pe_buffer(d_model: int, max_len: int = 100) -> jnp.ndarray:
    """Deterministic sinusoidal table, identical to the torch __init__ (f32)."""
    position = jnp.arange(max_len, dtype=jnp.float32)[:, None]               # (max_len, 1)
    div_term = jnp.exp(
        jnp.arange(0, d_model, 2, dtype=jnp.float32) * (-math.log(10000.0) / d_model)
    )                                                                         # (d_model/2,)
    pe = jnp.zeros((max_len, d_model), dtype=jnp.float32)
    pe = pe.at[:, 0::2].set(jnp.sin(position * div_term))
    pe = pe.at[:, 1::2].set(jnp.cos(position * div_term))
    return pe


def _sublane_multiple(dtype) -> int:
    # f32 -> 8, bf16 -> 16, int8/fp8 -> 32 (second-to-last block dim constraint).
    itemsize = jnp.dtype(dtype).itemsize
    return max(8, 32 // itemsize)


def _round_up(a: int, m: int) -> int:
    return ((a + m - 1) // m) * m


def _vmem_budget():
    """Generation-aware (vmem_limit_bytes, target_tile_bytes)."""
    try:
        phys = int(pltpu.get_tpu_info().vmem_capacity_bytes)
    except Exception:
        phys = 64 * 1024 * 1024          # conservative fallback: v7x (64 MiB / TC)
    # Scoped limit: 3/4 of physical, capped at 96 MiB.
    #   v7x (64 MiB)      -> 48 MiB limit, ~8 MiB tiles
    #   v5e/v6e (128 MiB) -> 96 MiB limit, ~16 MiB tiles
    vmem_limit = min((phys * 3) // 4, 96 * 1024 * 1024)
    # Pipeline footprint ~= 2*in + 2*out tiles + pe -> keep near 2/3 of the limit.
    target_tile = max(1 * 1024 * 1024, vmem_limit // 6)
    return vmem_limit, target_tile


def _pick_lane_tile(N: int, max_lanes: int) -> int:
    """Largest multiple of 128 <= max_lanes, preferring exact divisors of N so
    every block stays unmasked (lane-dense vst).  Caller guarantees max_lanes < N."""
    max_lanes = max(128, (max_lanes // 128) * 128)
    best_div = None
    lanes = 128
    while lanes <= max_lanes:
        if N % lanes == 0:
            best_div = lanes
        lanes += 128
    return best_div if best_div is not None else max_lanes


def positional_encoding_forward(x: jnp.ndarray, pe: jnp.ndarray) -> jnp.ndarray:
    """x: [seq_len, batch, d_model]; returns x + pe[:seq_len] (torch broadcast)."""
    S, B, D = x.shape
    # Faithful to the torch module as written: pe[:S] (S, D) broadcasts against
    # the trailing (batch, d_model) axes of x -> requires batch == seq_len.
    # (Intentional: this mirrors the original module, not a kernel limitation.)
    assert B == S, "original torch module's broadcast is only valid for batch == seq_len"
    assert pe.shape[0] >= B and pe.shape[1] == D

    N = B * D
    itemsize = jnp.dtype(x.dtype).itemsize
    sub = _sublane_multiple(x.dtype)
    vmem_limit, target_tile_bytes = _vmem_budget()

    # Lane-dense 2-D layout (free reshape for contiguous arrays). pe is indexed
    # by the *batch* coordinate per the torch semantics, hence pe[:B].
    x2 = x.reshape(S, N)
    pe_row = pe[:B].astype(x.dtype).reshape(1, N)   # cast once in the wrapper
    # TODO(synk): torch would promote e.g. f16 x + f32 pe to f32; we keep x.dtype.

    # ---- lane (last-dim) tiling: tile_n % 128 == 0 or tile_n == N -------------
    if sub * N * itemsize <= target_tile_bytes or N <= 128:
        tile_n = N                                   # full-width rows fit the budget
    else:
        tile_n = _pick_lane_tile(N, target_tile_bytes // (sub * itemsize))

    # ---- seq (sublane) tiling: tile_s % sub == 0 or tile_s == S ---------------
    budget_rows = target_tile_bytes // max(1, tile_n * itemsize)
    budget_rows = max(sub, (budget_rows // sub) * sub)
    tile_s = S if budget_rows >= S else budget_rows

    # ---- never collapse to a single grid block (v7x megacore needs >= 2) ------
    if pl.cdiv(S, tile_s) * pl.cdiv(N, tile_n) < 2:
        if S >= 2 * sub:
            tile_s = _round_up(pl.cdiv(S, 2), sub)                 # 2 seq blocks
        elif N >= 256:
            tile_n = max(128, _round_up(pl.cdiv(N, 2), 128))       # 2 lane blocks
        # else: array is a single minimal tile; a 1-block grid is unavoidable.

    n_lane = pl.cdiv(N, tile_n)
    n_seq = pl.cdiv(S, tile_s)
    # Lane blocks OUTER, seq blocks INNER: the pe column block index depends only
    # on the outer axis, so it is re-DMA'd once per outer step and stays resident
    # in VMEM across all inner (seq) steps.
    grid = (n_lane, n_seq)

    out2 = pl.pallas_call(
        pe_add_kernel,
        out_shape=jax.ShapeDtypeStruct((S, N), x.dtype),
        grid_spec=pl.GridSpec(
            grid=grid,
            in_specs=[
                pl.BlockSpec((tile_s, tile_n), lambda j, i: (i, j)),   # streamed x tiles
                pl.BlockSpec((1, tile_n), lambda j, i: (0, j)),        # resident pe column
            ],
            out_specs=pl.BlockSpec((tile_s, tile_n), lambda j, i: (i, j)),
        ),
        # The add is trivially in-place: let the output reuse x's HBM buffer
        # (free under jit with donation; XLA inserts a copy otherwise).
        input_output_aliases={0: 0},
        compiler_params=pltpu.CompilerParams(
            # Independent tiles on both axes -> shard across both TCs on v7x;
            # harmless on single-TC v5e/v6e.
            dimension_semantics=("parallel", "parallel"),
            vmem_limit_bytes=vmem_limit,
        ),
    )(x2, pe_row)

    return out2.reshape(S, B, D)


if __name__ == "__main__":
    d_model = 32
    max_len = 100
    seq_len = 8
    batch = 8  # == seq_len so the original torch broadcast is valid

    key = jax.random.PRNGKey(0)
    x = jax.random.normal(key, (seq_len, batch, d_model), dtype=jnp.float32)

    pe = make_pe_buffer(d_model, max_len)

    out = positional_encoding_forward(x, pe)
    out = jax.block_until_ready(out)

    # Pure-JAX reference with the identical (trailing-axis) broadcast semantics.
    ref = x + pe[:seq_len]
    assert out.shape == (seq_len, batch, d_model)
    assert jnp.allclose(out, ref, atol=1e-6, rtol=1e-6)

    print("KERNEL_OK")
</pallas_src>

<mosaic_0001>
module attributes {stable_mosaic.version = 11 : i64} {
  func.func @pe_add_kernel(%arg0: i32, %arg1: i32, %arg2: memref<8x128xf32, #tpu.memory_space<vmem>>, %arg3: memref<1x128xf32, #tpu.memory_space<vmem>>, %arg4: memref<8x128xf32, #tpu.memory_space<vmem>>) attributes {dimension_semantics = [#tpu.dimension_semantics<parallel>, #tpu.dimension_semantics<parallel>], iteration_bounds = array<i64: 2, 1>, scalar_prefetch = 0 : i64, scratch_operands = 0 : i64, tpu.core_type = #tpu.core_type<tc>, window_params = [{transform_indices = @transform_0, window_bounds = array<i64: 8, 128>}, {transform_indices = @transform_1, window_bounds = array<i64: 1, 128>}, {transform_indices = @transform_2, window_bounds = array<i64: 8, 128>}]} {
    %c0 = arith.constant 0 : index
    %c0_0 = arith.constant 0 : index
    %0 = vector.load %arg2[%c0, %c0_0] : memref<8x128xf32, #tpu.memory_space<vmem>>, vector<8x128xf32>
    %c0_1 = arith.constant 0 : index
    %c0_2 = arith.constant 0 : index
    %1 = vector.load %arg3[%c0_1, %c0_2] : memref<1x128xf32, #tpu.memory_space<vmem>>, vector<1x128xf32>
    %2 = vector.broadcast %1 : vector<1x128xf32> to vector<8x128xf32>
    %3 = arith.addf %0, %2 : vector<8x128xf32>
    %c0_3 = arith.constant 0 : index
    %c0_4 = arith.constant 0 : index
    %4 = vector.load %arg4[%c0_3, %c0_4] : memref<8x128xf32, #tpu.memory_space<vmem>>, vector<8x128xf32>
    tpu.vector_store %arg4[%c0_3, %c0_4], %3 {strides = array<i32>} : memref<8x128xf32, #tpu.memory_space<vmem>>, vector<8x128xf32>,
    return
  }
  func.func @transform_0(%arg0: i32, %arg1: i32) -> (i32, i32) {
    %c0_i32 = arith.constant 0 : i32
    return %arg1, %arg0 : i32, i32
  }
  func.func @transform_1(%arg0: i32, %arg1: i32) -> (i32, i32) {
    %c0_i32 = arith.constant 0 : i32
    %c0_i32_0 = arith.constant 0 : i32
    return %c0_i32, %arg0 : i32, i32
  }
  func.func @transform_2(%arg0: i32, %arg1: i32) -> (i32, i32) {
    %c0_i32 = arith.constant 0 : i32
    return %arg1, %arg0 : i32, i32
  }
}

</mosaic_0001>

<bundles_post_ra>
// kernel: tpu_custom_call.1
= control target key start
LH: loop header
LB: loop body
LE: loop exit
PB: predicated region body
PF: predicated region fallthrough
CT: control target
= control target key end

     0   :  { %7 = vsyncpa [#allocation3], 0  ;;  %s639_s0 = inlined_call_operand.hbm [shape: f32[8,256], index: 0, kind: input, shape index: {}, may-alias: {0,2}]   ;;  %s640_s1 = inlined_call_operand.vmem [shape: f32[1,256], index: 1, kind: input, shape index: {}]   ;;  %s641_s2 = inlined_call_operand.hbm [shape: f32[8,256], index: 2, kind: output, shape index: {}, may-alias: {0,2}]  }
   0x1   :  { %9 = vsyncpa [#allocation3 + $0x1], 0 }
   0x2   :  { %10 = vsyncpa [#allocation4], 0 }
   0x3   :  { %12 = vsyncpa [#allocation4 + $0x1], 0  ;;  %s514_s9 = smov 0   ;;  %s516_s10 = smov 0  }
   0x4   :  { %s518_s11 = smov 0   ;;  %s520_s12 = smov 0  }
   0x5   :  { %s522_s13 = smov 0   ;;  %s524_s14 = smov 0  }
   0x6 LB: > { %s309_s15 = sadd.s32 4294967295, %s497_s14   ;;  %s310_s16 = sadd.s32 4294967294, %s497_s14   ;;  %s497_s14 = sphi %s524_s14, %s18_s14   ;;  %s493_s13 = sphi %s522_s13, %s650_s13   ;;  %s489_s12 = sphi %s520_s12, %s649_s12   ;;  %s485_s11 = sphi %s518_s11, %s648_s11   ;;  %s481_s10 = sphi %s516_s10, %s647_s10   ;;  %s477_s9 = sphi %s514_s9, %s646_s9  }
   0x7   : > { %s30_s17 = sadd.s32 1, %s493_s13  ;;  %s39_s18 = sadd.s32 1, %s485_s11 }
   0x8   : > { %p32_p0 = scmp.ge.s32.totalorder %s30_s17, 2  ;;  %p46_p1 = scmp.ne.s32.totalorder %s485_s11, %s481_s10 }
   0x9   : > { %p47_p2 = scmp.eq.s32.totalorder %s497_s14, 0  ;;  %p52_p3 = scmp.ne.s32.totalorder %s481_s10, %s477_s9 }
   0xa   : > { %s652_s17 = smov (%p32_p0, %s30_s17), 0  ;;  %p53_p5 = scmp.eq.s32.totalorder %s309_s15, 0 }
   0xb   : > { %p555_p4 = por %p47_p2, %p46_p1  ;;  %s35_s20 = ssub.s32 %s493_s13, %s652_s17 }
   0xc   : > { %p104_p6 = scmp.eq.s32.totalorder %s309_s15, 1  ;;  %p37_p7 = scmp.eq.s32.totalorder %s35_s20, 0 }
   0xd   : > { %p561_p8 = por %p53_p5, %p52_p3  ;;  %p110_p10 = scmp.eq.s32.totalorder %s310_s16, 1 }
   0xe   : > { %p565_p9 = por %p104_p6, %p46_p1  ;;  %p312_p12 = scmp.ge.s32.totalorder %s497_s14, 2 }
   0xf   : > { %s570_s23 = scalar_select %p37_p7, %s485_s11, %s39_s18  }
  0x10   : > { %p572_p11 = por %p110_p10, %p52_p3  ;;  %p334_p13 = scmp.lt.s32.totalorder %s497_s14, 2 }
  0x11   : > { %s130_s25 = sand.u32 1, %s485_s11   ;;  %s314_s27 = sshll.u32 %s493_s13, 3 }
  0x12   : > { %s313_s26 = sshll.u32 %s130_s25, 3  ;;  %s140_s30 = scalar_lea.hbm %s639_s0, %s314_s27 }
  0x13   : > { %s134_s3 = scalar_lea.vmem [#allocation2], %s313_s26  ;;  %s142_s5 = sshll.u32 %s140_s30, 4  ;;  %s143_s5 = int_to_ptr.hbm [resolvable:$true] %s142_s5 }
  0x14   : > { %s144_s4 = sshll.u32 %s134_s3, 4  ;;  %p327_p0 = pnand %p334_p13, %p555_p4  ;;  %s145_s4 = int_to_ptr.vmem [resolvable:$true] %s144_s4 }
  0x15   : > { %p315_p1 = scmp.ge.s32.totalorder %s497_s14, 1  ;;  %p155_p2 = scmp.lt.s32.totalorder %s497_s14, 3 }
  0x16   : > { %s131_s6 = scalar_lea.sflag [#allocation3], %s130_s25 }
  0x17   : > { %329 = dma.hbm_to_vmem [thread:$0]  (!%p327_p0), %s143_s5, 128, %s145_s4, %s131_s6  }
  0x18   : > { %p156_p3 = pnand %p315_p1, %p155_p2 }
  0x19   : > { %s588_s7 = sand.u32 (!%p156_p3), 1, %s481_s10  }
  0x1a   : > { %159 = sbr.rel (%p156_p3) target bundleno = 49 (0x31), region = 28  ;;  %s316_s8 = sshll.u32 (!%p156_p3), %s588_s7, 3 }
  0x1b   : > { %s162_s15 = scalar_lea.sflag (!%p156_p3), [#allocation3], %s588_s7  ;;  %s165_s16 = scalar_lea.vmem (!%p156_p3), [#allocation2], %s316_s8 }
  0x1f   : > { %468 = dma.done.wait (%p561_p8), %s162_s15, 128  }
  0x20   : > { %470 = vsyncadd (%p561_p8), %s162_s15, 4294967168  ;;  %p190_p4 = scmp.lt.s32.totalorder %s489_s12, 1  ;;  %s319_s19 = sshll.u32 %s489_s12, 3  ;;  %v193_v0 = vld [vmem:[%s165_s16] sm:$0xff] }
  0x21   : > { %s213_s29 = scalar_lea.hbm %s641_s2, %s319_s19  ;;  %s189_s30 = scalar_lea.vmem [#allocation5], %s316_s8 }
  0x22   : > { %s191_s18 = scalar_select %p190_p4, %s489_s12, 1 }
  0x23   : > { %s215_s3 = sshll.u32 %s189_s30, 4  ;;  %s217_s21 = sshll.u32 %s213_s29, 4  ;;  %s216_s3 = int_to_ptr.vmem [resolvable:$true] %s215_s3  ;;  %s218_s21 = int_to_ptr.hbm [resolvable:$true] %s217_s21 }
  0x24   : > { %s192_s26 = scalar_lea.vmem %s640_s1, %s191_s18  ;;  %s201_s4 = scalar_lea.sflag [#allocation4], %s588_s7 }
  0x25   : > { %v384_v1 = vld [vmem:[%s192_s26] ss:$0 sm:$0xff]  ;;  %s429_s12 = sshra.s32 %s218_s21, 4  ;;  %s435_s8 = scalar_lea.hbm %s641_s2, 16  ;;  %s430_s12 = int_to_ptr.hbm [resolvable:$true] %s429_s12 }
  0x26   : > { %v198_v2 = vadd.f32 %v384_v1, %v193_v0  ;;  %s431_s5 = scalar_lea.hbm %s430_s12, 8  ;;  %p436_p8 = scmp.lt.s32.totalorder %s430_s12, %s641_s2 }
  0x27   : > { %p432_p5 = scmp.ne.s32.totalorder %s430_s12, %s431_s5  ;;  %p437_p10 = scmp.lt.s32.totalorder %s435_s8, %s431_s5 }
  0x28   : > { %199 = vst [vmem:[%s189_s30] sm:$0xff] %v198_v2 }
  0x29   : > { %p433_p6 = pnand %p432_p5, %p565_p9  ;;  %p438_p13 = por %p437_p10, %p436_p8 }
  0x2b   : > { %p434_p7 = pneg %p433_p6 }
  0x2d   : > { %p439_p0 = pnand %p438_p13, %p434_p7 }
  0x2f   : > { %442 = shalt.err (!%p439_p0)
}
  0x30   : > { %324 = dma.vmem_to_hbm [thread:$0]  (%p565_p9), %s216_s3, 128, %s218_s21, %s201_s4  }
  0x31 PF: > { %s229_s7 = sand.u32 1, %s477_s9   ;;  %p331_p1 = pnand %p312_p12, %p572_p11 }
  0x32   : > { %s230_s16 = scalar_lea.sflag [#allocation4], %s229_s7 }
  0x33   : > { %p332_p2 = pneg %p331_p1 }
  0x35   : > { %472 = dma.done.wait (%p332_p2), %s230_s16, 128  }
  0x36   : > { %474 = vsyncadd (%p332_p2), %s230_s16, 4294967168  ;;  %s18_s14 = sadd.s32 1, %s497_s14   ;;  %s646_s9 = smov %s481_s10 }
  0x37   : > { %p15_p3 = scmp.ge.s32.totalorder %s18_s14, 4   ;;  %s647_s10 = smov %s485_s11 }
  0x38   : > { %s648_s11 = smov %s570_s23  ;;  %s649_s12 = smov %s493_s13 }
  0x39   : > { %s650_s13 = smov %s652_s17  ;;  %17 = sbr.rel (!%p15_p3) target bundleno = 6 (0x6), region = 76 }
  0x3e   :  { %236 = vsyncpa [#allocation3], 1 }
  0x3f   :  { %238 = vsyncpa [#allocation3 + $0x1], 1 }
  0x40   :  { %239 = vsyncpa [#allocation4], 1 }
  0x41   :  { %241 = vsyncpa [#allocation4 + $0x1], 1 }

</bundles_post_ra>
